<compile_context>
chip_gen: v6e
topology: v6e:2x2x1
jax: 0.10.0
libtpu: 0.0.40
codegen_flags: <defaults>
</compile_context>

<pallas_src>
import jax
import jax.numpy as jnp
import numpy as np
from jax.experimental import pallas as pl
from jax.experimental.pallas import tpu as pltpu


_TILE_N = 512  # rows (sublanes) per grid step; (512, 2) f32 block => tiny VMEM footprint


def _round_up(x, m):
    return ((x + m - 1) // m) * m


def _affine_kernel(params_ref, loc_ref, out_ref):
    # params_ref: SMEM f32[6] = [t00, t01, t10, t11, trans_x, trans_y]
    # loc_ref   : VMEM (tile_n, 2) block of locations (native dtype, cast here)
    # out_ref   : VMEM (tile_n, 2) int32 block
    t00 = params_ref[0]
    t01 = params_ref[1]
    t10 = params_ref[2]
    t11 = params_ref[3]
    tx = params_ref[4]
    ty = params_ref[5]

    x = loc_ref[:, 0:1].astype(jnp.float32) - tx              # (tile_n, 1)
    y = loc_ref[:, 1:2].astype(jnp.float32) - ty              # (tile_n, 1)

    # (loc - trans) @ T expanded on the VPU (K = 2 -> never worth the MXU).
    # Each output column is computed and stored directly (no concat temp).
    # torch `.long()` truncates toward zero, as does astype(int32).
    out_ref[:, 0:1] = (x * t00 + y * t10).astype(jnp.int32)
    out_ref[:, 1:2] = (x * t01 + y * t11).astype(jnp.int32)


@jax.jit
def locations_augment_pallas(loc, tmat, u):
    """loc: (N, 2) locations (any real dtype); tmat: (2, 2) f32; u: (2,) f32 in [0, 1).
    Returns augmented locations as (N, 2) int32."""
    n = loc.shape[0]

    # --- hoisted scalar prologue (tiny; fused by XLA with the input read) -----
    # effective_sizes = max - min per coordinate, then
    # translation = randint(0, max(int(size), 1)) emulated as floor(u * bound),
    # clamped to bound - 1 so the exclusive upper bound is never reached.
    mx = jnp.max(loc, axis=0).astype(jnp.float32)              # (2,)
    mn = jnp.min(loc, axis=0).astype(jnp.float32)              # (2,)
    bound = jnp.maximum(jnp.trunc(mx - mn), 1.0)               # (2,)
    trans = jnp.minimum(jnp.floor(u * bound), bound - 1.0)     # (2,)
    params = jnp.concatenate([tmat.reshape(-1), trans]).astype(jnp.float32)  # (6,)

    # --- gridded, pipelined elementwise affine over N -------------------------
    tn = min(_TILE_N, _round_up(n, 8))
    grid = (pl.cdiv(n, tn),)
    return pl.pallas_call(
        _affine_kernel,
        out_shape=jax.ShapeDtypeStruct((n, 2), jnp.int32),
        grid=grid,
        in_specs=[
            pl.BlockSpec(memory_space=pltpu.MemorySpace.SMEM),   # f32[6] scalars
            pl.BlockSpec((tn, 2), lambda i: (i, 0)),             # locations tile
        ],
        out_specs=pl.BlockSpec((tn, 2), lambda i: (i, 0)),
        compiler_params=pltpu.CompilerParams(
            # N-axis is fully parallel -> both TensorCores on v7x split the work.
            dimension_semantics=("parallel",),
        ),
    )(params, loc)


class LocationsAugmentation:
    """JAX/Pallas port of the torch module. Runtime randomness is made
    deterministic via an explicit jax.random key."""

    def __init__(self, sampling=None, vflip=False, hflip=False, rotations=False,
                 vscale=False, hscale=False, crop=False):
        self.sampling = sampling
        self.vflip = vflip
        self.hflip = hflip
        self.rotations = rotations
        self.vscale = vscale
        self.hscale = hscale
        self.crop = crop  # unused in the reference forward as well

    def _transform_matrix(self, key):
        k_rot, k_h, k_v, k_sh, k_sv = jax.random.split(key, 5)
        t = jnp.eye(2, dtype=jnp.float32)
        if self.rotations:
            # NB: reference code passes degrees straight into cos/sin; reproduced as-is.
            theta = jax.random.uniform(k_rot, ()) * 360.0 - 180.0
            t = jnp.stack([
                jnp.stack([jnp.cos(theta), -jnp.sin(theta)]),
                jnp.stack([jnp.sin(theta), jnp.cos(theta)]),
            ]).astype(jnp.float32)
        if self.vflip or self.hflip:
            flip_h = (jnp.where(jax.random.randint(k_h, (), 0, 2) == 0, -1.0, 1.0)
                      if self.hflip else jnp.float32(1.0))
            flip_v = (jnp.where(jax.random.randint(k_v, (), 0, 2) == 0, -1.0, 1.0)
                      if self.vflip else jnp.float32(1.0))
            flip = jnp.stack([
                jnp.stack([flip_h, jnp.float32(0.0)]),
                jnp.stack([jnp.float32(0.0), flip_v]),
            ]).astype(jnp.float32)
            t = t @ flip
        if self.vscale or self.hscale:
            sh = (0.6 * jax.random.uniform(k_sh, ()) + 0.7
                  if self.hscale else jnp.float32(1.0))
            sv = (0.6 * jax.random.uniform(k_sv, ()) + 0.7
                  if self.vscale else jnp.float32(1.0))
            scale = jnp.stack([
                jnp.stack([sh, jnp.float32(0.0)]),
                jnp.stack([jnp.float32(0.0), sv]),
            ]).astype(jnp.float32)
            t = t @ scale
        return t

    def __call__(self, tiles, key):
        emb, loc = tiles
        # TODO(synk): integer `sampling` (random index gather) is a host-side data
        # selection step, not a kernel hot path; not implemented here.
        k_mat, k_trans = jax.random.split(key, 2)
        tmat = self._transform_matrix(k_mat)                    # (2, 2) f32
        u = jax.random.uniform(k_trans, (2,), dtype=jnp.float32)
        loc_out = locations_augment_pallas(loc, tmat, u)
        # torch `.clone()` of the embeddings: JAX arrays are immutable, so the
        # input array itself is the clone -- no copy, native dtype preserved.
        return (emb, loc_out), tmat, u


def _reference(emb, loc, tmat, u):
    """Pure-JAX re-statement of the torch forward (for verification).
    The 2x2 matmul is written column-wise (mathematically identical)."""
    loc_f = loc.astype(jnp.float32)
    mx = jnp.max(loc_f, axis=0)
    mn = jnp.min(loc_f, axis=0)
    bound = jnp.maximum(jnp.trunc(mx - mn), 1.0)
    trans = jnp.minimum(jnp.floor(u * bound), bound - 1.0)
    x = loc_f[:, 0:1] - trans[0]
    y = loc_f[:, 1:2] - trans[1]
    out0 = x * tmat[0, 0] + y * tmat[1, 0]
    out1 = x * tmat[0, 1] + y * tmat[1, 1]
    out = jnp.concatenate([out0, out1], axis=1).astype(jnp.int32)
    return emb, out


if __name__ == "__main__":
    key = jax.random.PRNGKey(0)
    k_emb, k_loc, k_aug, k_emb2, k_loc2, k_aug2 = jax.random.split(key, 6)

    aug = LocationsAugmentation(
        sampling=None, vflip=True, hflip=True, rotations=True,
        vscale=True, hscale=True, crop=False,
    )

    # Case 1: small N (single grid step), exact comparison.
    N1, F1 = 16, 32
    emb1 = jax.random.normal(k_emb, (N1, F1), dtype=jnp.float32)
    loc1 = jnp.floor(jax.random.uniform(k_loc, (N1, 2), dtype=jnp.float32) * 100.0)
    (emb_out1, loc_out1), tmat1, u1 = aug((emb1, loc1), k_aug)
    jax.block_until_ready((emb_out1, loc_out1))
    ref_emb1, ref_loc1 = _reference(emb1, loc1, tmat1, u1)
    np.testing.assert_array_equal(np.asarray(emb_out1), np.asarray(ref_emb1))
    np.testing.assert_array_equal(np.asarray(loc_out1), np.asarray(ref_loc1))
    assert emb_out1.shape == (N1, F1) and loc_out1.shape == (N1, 2)
    assert emb_out1.dtype == emb1.dtype and loc_out1.dtype == jnp.int32

    # Case 2: larger, ragged N (exercises the 1-D grid, double buffering and the
    # masked boundary block). Integer outputs may differ by at most 1 ULP-induced
    # truncation step vs. the XLA reference, so allow |diff| <= 1.
    N2, F2 = 1000, 8
    emb2 = jax.random.normal(k_emb2, (N2, F2), dtype=jnp.float32)
    loc2 = jnp.floor(jax.random.uniform(k_loc2, (N2, 2), dtype=jnp.float32) * 5000.0)
    (emb_out2, loc_out2), tmat2, u2 = aug((emb2, loc2), k_aug2)
    jax.block_until_ready((emb_out2, loc_out2))
    ref_emb2, ref_loc2 = _reference(emb2, loc2, tmat2, u2)
    np.testing.assert_array_equal(np.asarray(emb_out2), np.asarray(ref_emb2))
    np.testing.assert_allclose(np.asarray(loc_out2), np.asarray(ref_loc2), rtol=0, atol=1)
    assert loc_out2.shape == (N2, 2) and loc_out2.dtype == jnp.int32

    print("KERNEL_OK")
</pallas_src>

<mosaic_0001>
module attributes {stable_mosaic.version = 11 : i64} {
  func.func @_affine_kernel(%arg0: i32, %arg1: memref<6xf32, #tpu.memory_space<smem>>, %arg2: memref<16x2xf32, #tpu.memory_space<vmem>>, %arg3: memref<16x2xi32, #tpu.memory_space<vmem>>) attributes {dimension_semantics = [#tpu.dimension_semantics<parallel>], iteration_bounds = array<i64: 1>, scalar_prefetch = 0 : i64, scratch_operands = 0 : i64, tpu.core_type = #tpu.core_type<tc>, window_params = [{transform_indices = @transform_0, window_bounds = array<i64: 6>}, {transform_indices = @transform_1, window_bounds = array<i64: 16, 2>}, {transform_indices = @transform_2, window_bounds = array<i64: 16, 2>}]} {
    %c0 = arith.constant 0 : index
    %0 = memref.load %arg1[%c0] : memref<6xf32, #tpu.memory_space<smem>>
    %c1 = arith.constant 1 : index
    %1 = memref.load %arg1[%c1] : memref<6xf32, #tpu.memory_space<smem>>
    %c2 = arith.constant 2 : index
    %2 = memref.load %arg1[%c2] : memref<6xf32, #tpu.memory_space<smem>>
    %c3 = arith.constant 3 : index
    %3 = memref.load %arg1[%c3] : memref<6xf32, #tpu.memory_space<smem>>
    %c4 = arith.constant 4 : index
    %4 = memref.load %arg1[%c4] : memref<6xf32, #tpu.memory_space<smem>>
    %c5 = arith.constant 5 : index
    %5 = memref.load %arg1[%c5] : memref<6xf32, #tpu.memory_space<smem>>
    %c0_0 = arith.constant 0 : index
    %c0_1 = arith.constant 0 : index
    %6 = vector.load %arg2[%c0_0, %c0_1] : memref<16x2xf32, #tpu.memory_space<vmem>>, vector<16x1xf32>
    %7 = vector.broadcast %4 : f32 to vector<16x1xf32>
    %8 = arith.subf %6, %7 : vector<16x1xf32>
    %c0_2 = arith.constant 0 : index
    %c1_3 = arith.constant 1 : index
    %9 = vector.load %arg2[%c0_2, %c1_3] : memref<16x2xf32, #tpu.memory_space<vmem>>, vector<16x1xf32>
    %10 = vector.broadcast %5 : f32 to vector<16x1xf32>
    %11 = arith.subf %9, %10 : vector<16x1xf32>
    %12 = vector.broadcast %0 : f32 to vector<16x1xf32>
    %13 = arith.mulf %8, %12 : vector<16x1xf32>
    %14 = vector.broadcast %2 : f32 to vector<16x1xf32>
    %15 = arith.mulf %11, %14 : vector<16x1xf32>
    %16 = arith.addf %13, %15 : vector<16x1xf32>
    %17 = arith.fptosi %16 : vector<16x1xf32> to vector<16x1xi32>
    %c0_4 = arith.constant 0 : index
    %c0_5 = arith.constant 0 : index
    %18 = vector.load %arg3[%c0_4, %c0_5] : memref<16x2xi32, #tpu.memory_space<vmem>>, vector<16x1xi32>
    tpu.vector_store %arg3[%c0_4, %c0_5], %17 {strides = array<i32>} : memref<16x2xi32, #tpu.memory_space<vmem>>, vector<16x1xi32>,
    %19 = vector.broadcast %1 : f32 to vector<16x1xf32>
    %20 = arith.mulf %8, %19 : vector<16x1xf32>
    %21 = vector.broadcast %3 : f32 to vector<16x1xf32>
    %22 = arith.mulf %11, %21 : vector<16x1xf32>
    %23 = arith.addf %20, %22 : vector<16x1xf32>
    %24 = arith.fptosi %23 : vector<16x1xf32> to vector<16x1xi32>
    %c0_6 = arith.constant 0 : index
    %c1_7 = arith.constant 1 : index
    %25 = vector.load %arg3[%c0_6, %c1_7] : memref<16x2xi32, #tpu.memory_space<vmem>>, vector<16x1xi32>
    tpu.vector_store %arg3[%c0_6, %c1_7], %24 {strides = array<i32>} : memref<16x2xi32, #tpu.memory_space<vmem>>, vector<16x1xi32>,
    return
  }
  func.func @transform_0(%arg0: i32) -> i32 {
    %c0_i32 = arith.constant 0 : i32
    %c0_i32_0 = arith.constant 0 : i32
    return %c0_i32 : i32
  }
  func.func @transform_1(%arg0: i32) -> (i32, i32) {
    %c0_i32 = arith.constant 0 : i32
    %c0_i32_0 = arith.constant 0 : i32
    return %arg0, %c0_i32 : i32, i32
  }
  func.func @transform_2(%arg0: i32) -> (i32, i32) {
    %c0_i32 = arith.constant 0 : i32
    %c0_i32_0 = arith.constant 0 : i32
    return %arg0, %c0_i32 : i32, i32
  }
}

</mosaic_0001>

<bundles_post_ra>
// kernel: locations_augment_pallas.1
= control target key start
LH: loop header
LB: loop body
LE: loop exit
PB: predicated region body
PF: predicated region fallthrough
CT: control target
= control target key end

     0   :  { %7 = vsyncpa [#allocation3], 0  ;;  %s158_s0 = inlined_call_operand.vmem [shape: f32[6], index: 0, kind: input, shape index: {}]   ;;  %s159_s1 = inlined_call_operand.vmem [shape: f32[16,2], index: 1, kind: input, shape index: {}]   ;;  %s160_s2 = inlined_call_operand.vmem [shape: s32[16,2], index: 2, kind: output, shape index: {}]  }
   0x1   :  { %s14_s11 = sshll.u32 %s158_s0, 4  ;;  %s15_s11 = int_to_ptr.vmem [resolvable:$true] %s14_s11 }
   0x2   :  { %s105_s12 = scalar_lea.vmem %s15_s11, 16  ;;  %p110_p1 = scmp.lt.s32.totalorder %s15_s11, %s15_s11 }
   0x3   :  { %p106_p0 = scmp.ne.s32.totalorder %s15_s11, %s105_s12  ;;  %p111_p2 = scmp.lt.s32.totalorder %s105_s12, %s105_s12 }
   0x5   :  { %p112_p3 = por %p111_p2, %p110_p1 }
   0x7   :  { %p113_p4 = pnand %p112_p3, %p106_p0 }
   0x9   :  { %116 = shalt.err (!%p113_p4)
}
   0xa   :  { %s119_s13 = smov [#allocation2]  }
   0xb   :  { %17 = dma.vmem_to_smem %s15_s11, 16, %s119_s13, [#allocation3]  }
   0xc   :  { %117 = dma.done.wait [#allocation3], 16  }
   0xd   :  { %118 = vsyncadd [#allocation3], 4294967280 }
   0xe   :  { %23 = sfence }
   0xf   :  { %s91_s14 = sld [smem:[#allocation2 + $0x3]]  ;;  %v30_v0 = vld [vmem:[%s159_s1] sm:$0xff]  ;;  %v31_v1 = vld [vmem:[%s159_s1 + $0x8] sm:$0xff]  ;;  %s120_s20 = smov 127   ;;  %vm56_vm0 = vcmask 7168   ;;  %vm81_vm1 = vcmask 15368  }
  0x10   :  { %s93_s15 = sld [smem:[#allocation2 + $0x5]]  ;;  %s121_s1 = smov 1  }
  0x11   :  { %s90_s16 = sld [smem:[#allocation2 + $0x2]] }
  0x12   :  { %s92_s21 = sld [smem:[#allocation2 + $0x4]] }
  0x13   :  { %s89_s22 = sld [smem:[#allocation2 + $0x1]] }
  0x14   :  { %s24_s23 = sld [smem:[#allocation2]] }
  0x15   :  { %v62_v3 = vstv %s91_s14 }
  0x16   :  { %v35_v2 = vstv %s93_s15 }
  0x17   :  { %v36_v4 = vsub.f32 %v30_v0, %v35_v2  ;;  %v37_v5 = vsub.f32 %v31_v1, %v35_v2  ;;  %v41_v7 = vstv %s90_s16 }
  0x18   :  { %v32_v11 = vstv %s92_s21 }
  0x19   :  { %v63_v6 = vmul.f32 %v62_v3, %v36_v4  ;;  %v42_v8 = vmul.f32 %v41_v7, %v36_v4  ;;  %v64_v9 = vmul.f32 %v62_v3, %v37_v5  ;;  %v43_v10 = vmul.f32 %v41_v7, %v37_v5 }
  0x1a   :  { %v33_v12 = vsub.f32 %v30_v0, %v32_v11  ;;  %v59_v13 = vstv %s89_s22  ;;  %v38_v14 = vstv %s24_s23  ;;  %v34_v16 = vsub.f32 %v31_v1, %v32_v11 }
  0x1b   :  { %67 = vrot.lane.b32.xlu0 %v63_v6, %s120_s20  ;;  %46 = vrot.lane.b32.xlu1 %v42_v8, %s120_s20 }
  0x1c   :  { %v60_v15 = vmul.f32 %v59_v13, %v33_v12  ;;  %v39_v17 = vmul.f32 %v38_v14, %v33_v12  ;;  %v61_v20 = vmul.f32 %v59_v13, %v34_v16  ;;  %v40_v23 = vmul.f32 %v38_v14, %v34_v16 }
  0x1f   :  { %69 = vrot.lane.b32.xlu0 %v64_v9, %s120_s20  ;;  %48 = vrot.lane.b32.xlu1 %v43_v10, %s120_s20 }
  0x8d   :  { %v68_v18 = vpop.permute.xlu0 %67  ;;  %v47_v21 = vpop.permute.xlu1 %46 }
  0x8e   :  { %v73_v19 = vadd.f32 %v68_v18, %v60_v15  ;;  %v52_v22 = vadd.f32 %v47_v21, %v39_v17 }
  0x90   :  { %v98_v24 = vtrunc.f32 %v73_v19  ;;  %v94_v26 = vtrunc.f32 %v52_v22 }
  0x91   :  { %v70_v25 = vpop.permute.xlu0 %69  ;;  %v49_v29 = vpop.permute.xlu1 %48 }
  0x92   :  { %v99_v27 = vcvt.f32.s32 %v98_v24  ;;  %v74_v28 = vadd.f32 %v70_v25, %v61_v20  ;;  %v95_v30 = vcvt.f32.s32 %v94_v26  ;;  %v53_v31 = vadd.f32 %v49_v29, %v40_v23 }
  0x94   :  { %v100_v32 = vtrunc.f32 %v74_v28  ;;  %77 = vrot.lane.b32.xlu0 %v99_v27, %s121_s1  ;;  %57 = vst.msk [vmem:[%s160_s2] sm:$0xff] %vm56_vm0, %v95_v30  ;;  %v96_v33 = vtrunc.f32 %v53_v31 }
  0x96   :  { %v101_v34 = vcvt.f32.s32 %v100_v32  ;;  %v97_v35 = vcvt.f32.s32 %v96_v33 }
  0x98   :  { %79 = vrot.lane.b32.xlu1 %v101_v34, %s121_s1  ;;  %58 = vst.msk [vmem:[%s160_s2 + $0x8] sm:$0xff] %vm56_vm0, %v97_v35 }
 0x106   :  { %v78_v36 = vpop.permute.xlu0 %77 }
 0x107   :  { %82 = vst.msk [vmem:[%s160_s2] sm:$0xff] %vm81_vm1, %v78_v36 }
 0x10a   :  { %v80_v37 = vpop.permute.xlu1 %79 }
 0x10b   :  { %83 = vst.msk [vmem:[%s160_s2 + $0x8] sm:$0xff] %vm81_vm1, %v80_v37 }
 0x10c   :  { %88 = vsyncpa [#allocation3], 1 }

</bundles_post_ra>
